<compile_context>
chip_gen: v5e
topology: v5e:2x2
jax: 0.10.0
libtpu: 0.0.40
codegen_flags: <defaults>
</compile_context>

<pallas_src>
import functools
import math

import jax
import jax.numpy as jnp
from jax.experimental import pallas as pl
from jax.experimental.pallas import tpu as pltpu

_LANE = 128
_MIB = 1024 * 1024


def _round_up(x: int, m: int) -> int:
    return (x + m - 1) // m * m


def _sublane_multiple(dtype) -> int:
    # Packed sublane rows per native tile: 8 for 4-byte, 16 for bf16, 32 for int8/fp8.
    return max(8, 32 // jnp.dtype(dtype).itemsize)


def _vmem_capacity_bytes() -> int:
    # 128 MiB on v5e/v6e, 64 MiB per TensorCore on v7x. Fall back to the
    # smallest (v7x) figure if the query is unavailable.
    try:
        cap = int(pltpu.get_tpu_info().vmem_capacity_bytes)
        if cap > 0:
            return cap
    except Exception:
        pass
    return 64 * _MIB


def _select_tk(K: int):
    """Reduction tile. Prefer a single k-step (tk == K): no accumulator
    scratch, no K padding, no round-up waste for small d_model."""
    if K <= 512:
        return K, K
    for c in (512, 256, 128):
        if K % c == 0:
            return c, K
    return 512, _round_up(K, 512)  # rare fallback: pad K once at init


def _select_tn(N: int):
    """Output-feature tile. Lane-aligned; prefer wide (512/256) panels for the
    256x256 MXU but keep >=2 N blocks when possible so both v7x TensorCores
    get parallel work even when M fits in a single tile."""
    Np = _round_up(N, _LANE)
    for c in (512, 256, 128):
        if Np % c == 0 and Np // c >= 2:
            return c, Np
    return Np, Np  # small N: a single lane-aligned block


def _select_tm(M: int, tk: int, tn: int, in_bytes: int, out_bytes: int,
               needs_acc: bool, budget: int, sub: int) -> int:
    """Tall activation tiles (up to 1024 rows) minimise how often the weight
    panel is re-streamed from HBM; shrink until the double-buffered block
    footprint fits the per-generation VMEM budget."""
    if M <= 1024:
        tm = _round_up(M, sub)
    else:
        n_blocks = -(-M // 1024)
        tm = _round_up(-(-M // n_blocks), sub)

    def footprint(t: int) -> int:
        return (2 * t * tk * in_bytes          # x blocks (double-buffered)
                + 2 * tk * tn * in_bytes       # w blocks
                + 2 * tn * 4                   # f32 bias blocks
                + 2 * t * tn * out_bytes       # out blocks
                + (t * tn * 4 if needs_acc else 0))  # f32 accumulator scratch

    while tm > sub and footprint(tm) > budget:
        tm = max(sub, _round_up(tm // 2, sub))
    return tm


# --------------------------------------------------------------------------- #
# Kernels
# --------------------------------------------------------------------------- #
def _qkernel_single_k(x_ref, w_ref, b_ref, o_ref):
    # Whole reduction in one MXU pass: write the output block directly.
    o_ref[...] = (
        jnp.dot(x_ref[...], w_ref[...], preferred_element_type=jnp.float32)
        + b_ref[...]
    ).astype(o_ref.dtype)


def _qkernel_multi_k_inplace(x_ref, w_ref, b_ref, o_ref):
    # f32 output block stays resident across the k axis: accumulate in place.
    k = pl.program_id(2)

    @pl.when(k == 0)
    def _():
        o_ref[...] = jnp.broadcast_to(b_ref[...], o_ref.shape)

    o_ref[...] += jnp.dot(x_ref[...], w_ref[...],
                          preferred_element_type=jnp.float32)


def _qkernel_multi_k_scratch(x_ref, w_ref, b_ref, o_ref, acc_ref):
    # Non-f32 output: accumulate in an f32 VMEM scratch, cast at the last step.
    k = pl.program_id(2)

    @pl.when(k == 0)
    def _():
        acc_ref[...] = jnp.zeros_like(acc_ref)

    acc_ref[...] += jnp.dot(x_ref[...], w_ref[...],
                            preferred_element_type=jnp.float32)

    @pl.when(k == pl.num_programs(2) - 1)
    def _():
        o_ref[...] = (acc_ref[...] + b_ref[...]).astype(o_ref.dtype)


# --------------------------------------------------------------------------- #
# Jitted forward
# --------------------------------------------------------------------------- #
@functools.partial(
    jax.jit,
    static_argnames=("n_out", "tn", "tk", "compute_dtype",
                     "vmem_limit_cap", "tile_budget", "w_buffers"),
)
def _query_forward(x, w_kn, b_1n, *, n_out, tn, tk, compute_dtype,
                   vmem_limit_cap, tile_budget, w_buffers):
    B, S, K = x.shape
    Kp, Np = w_kn.shape
    M = B * S
    out_dtype = jnp.dtype(x.dtype)

    cdt = jnp.dtype(compute_dtype) if compute_dtype is not None else out_dtype
    in_bytes = cdt.itemsize
    out_bytes = out_dtype.itemsize
    sub = _sublane_multiple(cdt)

    k_steps = Kp // tk
    needs_acc = (k_steps > 1) and (out_dtype != jnp.dtype(jnp.float32))
    tm = _select_tm(M, tk, tn, in_bytes, out_bytes, needs_acc,
                    tile_budget, sub)
    Mp = _round_up(M, tm)

    x2d = x.reshape(M, K)
    if compute_dtype is not None and x2d.dtype != cdt:
        x2d = x2d.astype(cdt)
    if Mp != M or Kp != K:
        x2d = jnp.pad(x2d, ((0, Mp - M), (0, Kp - K)))

    footprint = (2 * tm * tk * in_bytes
                 + max(2, w_buffers) * tk * tn * in_bytes
                 + 2 * tn * 4
                 + 2 * tm * tn * out_bytes
                 + (tm * tn * 4 if needs_acc else 0))
    vmem_limit = min(vmem_limit_cap, max(32 * _MIB, int(footprint * 1.5)))

    cost = pl.CostEstimate(
        flops=2 * Mp * Np * Kp,
        transcendentals=0,
        bytes_accessed=(Mp * Kp * in_bytes + Kp * Np * in_bytes
                        + Np * 4 + Mp * Np * out_bytes),
    )

    w_kwargs = {}
    if w_buffers != 2:
        # Deeper pipelining on the streamed weight panel (sweep when profiling
        # shows exposed DMA).
        w_kwargs["pipeline_mode"] = pl.Buffered(w_buffers)

    if k_steps == 1:
        out = pl.pallas_call(
            _qkernel_single_k,
            out_shape=jax.ShapeDtypeStruct((Mp, Np), out_dtype),
            grid_spec=pltpu.PrefetchScalarGridSpec(
                num_scalar_prefetch=0,
                grid=(Mp // tm, Np // tn),
                in_specs=[
                    pl.BlockSpec((tm, Kp), lambda i, j: (i, 0)),
                    pl.BlockSpec((Kp, tn), lambda i, j: (0, j), **w_kwargs),
                    pl.BlockSpec((1, tn), lambda i, j: (0, j)),
                ],
                out_specs=pl.BlockSpec((tm, tn), lambda i, j: (i, j)),
            ),
            compiler_params=pltpu.CompilerParams(
                dimension_semantics=("parallel", "parallel"),
                vmem_limit_bytes=vmem_limit),
            cost_estimate=cost,
        )(x2d, w_kn, b_1n)
    else:
        kernel = _qkernel_multi_k_scratch if needs_acc else _qkernel_multi_k_inplace
        scratch = ((pltpu.VMEM((tm, tn), jnp.float32),) if needs_acc else ())
        out = pl.pallas_call(
            kernel,
            out_shape=jax.ShapeDtypeStruct((Mp, Np), out_dtype),
            grid_spec=pltpu.PrefetchScalarGridSpec(
                num_scalar_prefetch=0,
                grid=(Mp // tm, Np // tn, k_steps),
                in_specs=[
                    pl.BlockSpec((tm, tk), lambda i, j, k: (i, k)),
                    pl.BlockSpec((tk, tn), lambda i, j, k: (k, j), **w_kwargs),
                    pl.BlockSpec((1, tn), lambda i, j, k: (0, j)),
                ],
                out_specs=pl.BlockSpec((tm, tn), lambda i, j, k: (i, j)),
                scratch_shapes=scratch,
            ),
            compiler_params=pltpu.CompilerParams(
                dimension_semantics=("parallel", "parallel", "arbitrary"),
                vmem_limit_bytes=vmem_limit),
            cost_estimate=cost,
        )(x2d, w_kn, b_1n)

    if Mp != M or Np != n_out:
        out = out[:M, :n_out]
    return out.reshape(B, S, n_out)


# --------------------------------------------------------------------------- #
# Module wrapper (one-time weight preparation, outside the jitted forward)
# --------------------------------------------------------------------------- #
class PallasQueryLayer:
    """Pallas-TPU QueryLayer: forward(x) == x @ weight.T + bias.

    `weight` uses the nn.Linear layout [out_features, in_features] =
    [d_model * n_heads, d_model]; `bias` is [d_model * n_heads].
    The weight is transposed, cast (bf16 by default) and padded ONCE here.
    """

    def __init__(self, weight, bias, *, compute_dtype=jnp.bfloat16, w_buffers=2):
        weight = jnp.asarray(weight)
        bias = jnp.asarray(bias)
        assert weight.ndim == 2 and bias.shape == (weight.shape[0],)
        self.n_out = int(weight.shape[0])
        self.d_in = int(weight.shape[1])
        self.compute_dtype = (None if compute_dtype is None
                              else jnp.dtype(compute_dtype))
        self.w_buffers = int(w_buffers)

        self.tk, kp = _select_tk(self.d_in)
        self.tn, np_ = _select_tn(self.n_out)

        w_kn = weight.T  # [K, N]
        if self.compute_dtype is not None:
            w_kn = w_kn.astype(self.compute_dtype)
        if (kp, np_) != (self.d_in, self.n_out):
            w_kn = jnp.pad(w_kn, ((0, kp - self.d_in), (0, np_ - self.n_out)))
        self.w_kn = w_kn

        b = bias.astype(jnp.float32)  # keep the bias in f32 end-to-end
        if np_ != self.n_out:
            b = jnp.pad(b, (0, np_ - self.n_out))
        self.b_1n = b.reshape(1, np_)

        cap = _vmem_capacity_bytes()
        # ~3/4 of device VMEM as the compiler limit (48 MiB on v7x, 96 MiB on
        # v5e/v6e), and ~half of that as the tile footprint budget.
        self.vmem_limit_cap = min(cap * 3 // 4, 96 * _MIB)
        self.tile_budget = self.vmem_limit_cap // 2

    def __call__(self, x):
        assert x.ndim == 3 and x.shape[-1] == self.d_in
        return _query_forward(
            x, self.w_kn, self.b_1n,
            n_out=self.n_out, tn=self.tn, tk=self.tk,
            compute_dtype=self.compute_dtype,
            vmem_limit_cap=self.vmem_limit_cap,
            tile_budget=self.tile_budget,
            w_buffers=self.w_buffers,
        )


# --------------------------------------------------------------------------- #
# Demo / self-test
# --------------------------------------------------------------------------- #
if __name__ == "__main__":
    def make_inputs(key, B, S, d_model, n_heads):
        N = d_model * n_heads
        kx, kw, kb = jax.random.split(key, 3)
        bound = 1.0 / math.sqrt(d_model)
        x = jax.random.normal(kx, (B, S, d_model), dtype=jnp.float32)
        w = jax.random.uniform(kw, (N, d_model), minval=-bound, maxval=bound,
                               dtype=jnp.float32)
        b = jax.random.uniform(kb, (N,), minval=-bound, maxval=bound,
                               dtype=jnp.float32)
        return x, w, b

    # 1) Default bf16-compute path: d_model=32, n_heads=4, B=2, S=8.
    x, w, b = make_inputs(jax.random.PRNGKey(0), 2, 8, 32, 4)
    layer = PallasQueryLayer(w, b)  # compute_dtype=bf16 by default
    out = layer(x)
    jax.block_until_ready(out)
    # Reference for the bf16 path: exact f32 math on bf16-rounded inputs.
    x_r = x.astype(jnp.bfloat16).astype(jnp.float32)
    w_r = w.astype(jnp.bfloat16).astype(jnp.float32)
    ref = x_r @ w_r.T + b
    assert out.shape == (2, 8, 128)
    assert jnp.allclose(out, ref, atol=1e-3, rtol=1e-3), "bf16 path mismatch"

    # 2) Full-f32 path (exact module semantics), same shapes.
    layer_f32 = PallasQueryLayer(w, b, compute_dtype=None)
    out_f32 = layer_f32(x)
    jax.block_until_ready(out_f32)
    ref_f32 = x @ w.T + b
    assert jnp.allclose(out_f32, ref_f32, atol=1e-5, rtol=1e-5), "f32 path mismatch"

    # 3) Ragged / non-aligned shapes (d_model=48, n_heads=3, S=7): exercises
    #    the one-time N padding and the per-call M padding / output slice.
    x3, w3, b3 = make_inputs(jax.random.PRNGKey(1), 2, 7, 48, 3)
    layer3 = PallasQueryLayer(w3, b3, compute_dtype=None)
    out3 = layer3(x3)
    jax.block_until_ready(out3)
    ref3 = x3 @ w3.T + b3
    assert out3.shape == (2, 7, 144)
    assert jnp.allclose(out3, ref3, atol=1e-5, rtol=1e-5), "ragged path mismatch"

    # 4) Multi-k-step path (d_model=640 -> tk=128, 5 reduction steps,
    #    in-place f32 accumulation into the resident output block).
    x4, w4, b4 = make_inputs(jax.random.PRNGKey(2), 2, 8, 640, 1)
    layer4 = PallasQueryLayer(w4, b4, compute_dtype=None)
    out4 = layer4(x4)
    jax.block_until_ready(out4)
    ref4 = x4 @ w4.T + b4
    assert out4.shape == (2, 8, 640)
    assert jnp.allclose(out4, ref4, atol=1e-2, rtol=1e-2), "multi-k path mismatch"

    print("KERNEL_OK")
</pallas_src>

<mosaic_0001>
module attributes {stable_mosaic.version = 11 : i64} {
  func.func @_qkernel_single_k(%arg0: i32, %arg1: i32, %arg2: memref<16x32xbf16, #tpu.memory_space<vmem>>, %arg3: memref<32x128xbf16, #tpu.memory_space<vmem>>, %arg4: memref<1x128xf32, #tpu.memory_space<vmem>>, %arg5: memref<16x128xf32, #tpu.memory_space<vmem>>) attributes {dimension_semantics = [#tpu.dimension_semantics<parallel>, #tpu.dimension_semantics<parallel>], iteration_bounds = array<i64: 1, 1>, scalar_prefetch = 0 : i64, scratch_operands = 0 : i64, tpu.core_type = #tpu.core_type<tc>, window_params = [{transform_indices = @transform_0, window_bounds = array<i64: 16, 32>}, {transform_indices = @transform_1, window_bounds = array<i64: 32, 128>}, {transform_indices = @transform_2, window_bounds = array<i64: 1, 128>}, {transform_indices = @transform_3, window_bounds = array<i64: 16, 128>}]} {
    %c0 = arith.constant 0 : index
    %c0_0 = arith.constant 0 : index
    %0 = vector.load %arg2[%c0, %c0_0] : memref<16x32xbf16, #tpu.memory_space<vmem>>, vector<16x32xbf16>
    %c0_1 = arith.constant 0 : index
    %c0_2 = arith.constant 0 : index
    %1 = vector.load %arg3[%c0_1, %c0_2] : memref<32x128xbf16, #tpu.memory_space<vmem>>, vector<32x128xbf16>
    %cst = arith.constant dense<0.000000e+00> : vector<16x128xf32>
    %2 = tpu.matmul %0, %1, %cst {dimension_numbers = #tpu.dot_dimension_numbers<[1], [0], [0], [1], [0, 0, 1, 1], [], []>} : vector<16x32xbf16>, vector<32x128xbf16>, vector<16x128xf32> -> vector<16x128xf32>
    %c0_3 = arith.constant 0 : index
    %c0_4 = arith.constant 0 : index
    %3 = vector.load %arg4[%c0_3, %c0_4] : memref<1x128xf32, #tpu.memory_space<vmem>>, vector<1x128xf32>
    %4 = vector.broadcast %3 : vector<1x128xf32> to vector<16x128xf32>
    %5 = arith.addf %2, %4 : vector<16x128xf32>
    %c0_5 = arith.constant 0 : index
    %c0_6 = arith.constant 0 : index
    %6 = vector.load %arg5[%c0_5, %c0_6] : memref<16x128xf32, #tpu.memory_space<vmem>>, vector<16x128xf32>
    tpu.vector_store %arg5[%c0_5, %c0_6], %5 {strides = array<i32>} : memref<16x128xf32, #tpu.memory_space<vmem>>, vector<16x128xf32>,
    return
  }
  func.func @transform_0(%arg0: i32, %arg1: i32) -> (i32, i32) {
    %c0_i32 = arith.constant 0 : i32
    %c0_i32_0 = arith.constant 0 : i32
    return %arg0, %c0_i32 : i32, i32
  }
  func.func @transform_1(%arg0: i32, %arg1: i32) -> (i32, i32) {
    %c0_i32 = arith.constant 0 : i32
    %c0_i32_0 = arith.constant 0 : i32
    return %c0_i32, %arg1 : i32, i32
  }
  func.func @transform_2(%arg0: i32, %arg1: i32) -> (i32, i32) {
    %c0_i32 = arith.constant 0 : i32
    %c0_i32_0 = arith.constant 0 : i32
    return %c0_i32, %arg1 : i32, i32
  }
  func.func @transform_3(%arg0: i32, %arg1: i32) -> (i32, i32) {
    %c0_i32 = arith.constant 0 : i32
    return %arg0, %arg1 : i32, i32
  }
}

</mosaic_0001>

<bundles_post_ra>
// kernel: _query_forward.1
= control target key start
LH: loop header
LB: loop body
LE: loop exit
PB: predicated region body
PF: predicated region fallthrough
CT: control target
= control target key end

     0   :  { %s165_s0 = inlined_call_operand.vmem [shape: bf16[16,32], index: 0, kind: input, shape index: {}]   ;;  %s166_s1 = inlined_call_operand.vmem [shape: bf16[32,128], index: 1, kind: input, shape index: {}]   ;;  %s167_s2 = inlined_call_operand.vmem [shape: f32[1,128], index: 2, kind: input, shape index: {}]   ;;  %s168_s3 = inlined_call_operand.hbm [shape: f32[16,128], index: 3, kind: output, shape index: {}]  }
   0x1   :  { %v96_v0 = vld [vmem:[%s166_s1 + $0x8] sm:$0xff] }
   0x2   :  { %8 = vsyncpa [#allocation3], 0  ;;  %53 = vmatpush.bf16.msra.mxu0 %v96_v0  ;;  %v95_v1 = vld [vmem:[%s166_s1] sm:$0xff]  ;;  %vm43_vm0 = vcmask 261120   ;;  %s127_s20 = smov [#allocation2]   ;;  %s69_s1 = sshll.u32 %s168_s3, 4  ;;  %s70_s1 = int_to_ptr.hbm [resolvable:$true] %s69_s1 }
   0x3   :  { %v94_v2 = vld [vmem:[%s165_s0] sm:$0xff]  ;;  %s67_s21 = sshll.u32 %s127_s20, 4  ;;  %s128_s0 = smov 128   ;;  %s68_s21 = int_to_ptr.vmem [resolvable:$true] %s67_s21 }
   0x4   :  { %v100_v3 = vld [vmem:[%s167_s2] ss:$0 sm:$0xff]  ;;  %s129_s24 = smov 8  }
   0x6   :  { %54 = vmatpush.bf16.msra.mxu0 %v95_v1 }
   0x9   :  { %93 = vmatmul.msk.bf16.vlgmr.msra.gmra.mxu0 %vm43_vm0, %v94_v2 }
  0x86   :  { %v56_v4 = vpop.f32.mrf.mxu0 }
  0x87   :  { %v57_v5 = vadd.f32 %v100_v3, %v56_v4 }
  0x89   :  { %61 = vst [vmem:[#allocation2] sm:$0xff] %v57_v5 }
  0x8e   :  { %v58_v6 = vpop.f32.mrf.mxu0 }
  0x8f   :  { %v59_v7 = vadd.f32 %v100_v3, %v58_v6 }
  0x91   :  { %62 = vst [vmem:[#allocation2 + $0x8] sm:$0xff] %v59_v7 }
  0x92   :  { %75 = dma.vmem_to_hbm [thread:$0]  %s68_s21, 256, %s70_s1, [#allocation3], %s128_s0, %s128_s0, %s129_s24  }
  0x93   :  { %125 = dma.done.wait [#allocation3], 256  }
  0x94   :  { %126 = vsyncadd [#allocation3], 4294967040 }
  0x95   :  { %80 = vsyncpa [#allocation3], 1 }

</bundles_post_ra>
